<compile_context>
chip_gen: v6e
topology: v6e:2x2x1
jax: 0.10.0
libtpu: 0.0.40
codegen_flags: <defaults>
</compile_context>

<pallas_src>
import jax
import jax.numpy as jnp
from jax.experimental import pallas as pl
from jax.experimental.pallas import tpu as pltpu


def _copy_kernel(x_ref, o_ref):
    # Pure streaming copy of a lane-dense 2-D tile: vld/vst only, no relayout.
    o_ref[...] = x_ref[...]


def _round_up(v: int, m: int) -> int:
    return ((v + m - 1) // m) * m


def _choose_slab(n: int, flat: int) -> tuple[int, int]:
    """Row-major (rows, cols) factoring of n*flat for a lane/sublane-dense copy.

    Reshaping to the slab and back is metadata-only, so any factoring that
    preserves element count and row-major order is semantically free.
    """
    total = n * flat
    rows, cols = n, flat
    # Only bother re-factoring when the natural view is sublane- or
    # lane-starved and the tensor is big enough for it to matter.
    if (rows < 8 or cols < 128) and total >= 8 * 128:
        best = None
        c = 128
        limit = min(total, 1 << 16)
        while c <= limit:
            if total % c == 0 and (total // c) >= 8:
                best = c  # keep the largest lane-dense divisor with >= 8 rows
            c += 128
        if best is not None:
            rows, cols = total // best, best
    return rows, cols


def _choose_tiles(rows: int, cols: int, dsize: int) -> tuple[int, int, int]:
    # Packed-sublane granularity: 8 for 32-bit, 16 for bf16, 32 for int8.
    g = max(8, 32 // dsize)

    if rows >= g:
        # Round UP (Pallas masks the overhang) so a nearly-empty trailing row
        # tile never doubles the grid; cap at 256 rows per tile.
        tn = min(256, _round_up(min(rows, 256), g))
    else:
        tn = rows  # full-extent block is always legal

    # Lane tile: dtype-scaled to ~8 KiB per row (2048 f32 / 4096 bf16 / 8192
    # int8 elements), always a multiple of 128 so only the final j-block pays
    # a masked vst; never depends on `cols` being 128-aligned.
    tf_base = 8192 // dsize
    if cols >= 128:
        tf = min(tf_base, _round_up(cols, 128))
    else:
        tf = cols  # full-extent block is always legal
    return tn, tf, g


def _split_for_megacore(rows: int, cols: int, tn: int, tf: int, g: int):
    """Guarantee >= 2 grid blocks so both v7x TensorCores get work."""
    if pl.cdiv(rows, tn) * pl.cdiv(cols, tf) > 1:
        return tn, tf
    if cols > 256:
        tf = max(128, _round_up(pl.cdiv(cols, 2), 128))
    elif rows > 2 * g:
        tn = max(g, _round_up(pl.cdiv(rows, 2), g))
    return tn, tf


def flatten(x: jax.Array) -> jax.Array:
    """Pallas equivalent of torch `input.view(input.size(0), -1)`."""
    n = x.shape[0]
    flat = 1
    for d in x.shape[1:]:
        flat *= d

    # Degenerate / empty tensors: the metadata-only reshape is exact and free.
    if n == 0 or flat == 0:
        return x.reshape(n, flat)

    dsize = jnp.dtype(x.dtype).itemsize

    rows, cols = _choose_slab(n, flat)
    tn, tf, g = _choose_tiles(rows, cols, dsize)
    tn, tf = _split_for_megacore(rows, cols, tn, tf, g)

    grid = (pl.cdiv(rows, tn), pl.cdiv(cols, tf))

    # in + out tiles, double-buffered by the default pipeline.
    pipelined_bytes = 4 * tn * tf * dsize
    try:
        phys_vmem = int(pltpu.get_tpu_info().vmem_capacity_bytes)
    except Exception:
        phys_vmem = 64 * 1024 * 1024  # conservative (v7x) if query unavailable
    cap = min((phys_vmem * 3) // 4, 96 * 1024 * 1024)
    vmem_limit = int(min(max(2 * pipelined_bytes, 32 * 1024 * 1024), cap))

    x2 = x.reshape(rows, cols)  # metadata-only

    out2 = pl.pallas_call(
        _copy_kernel,
        out_shape=jax.ShapeDtypeStruct((rows, cols), x.dtype),
        grid=grid,
        in_specs=[pl.BlockSpec((tn, tf), lambda i, j: (i, j))],
        out_specs=pl.BlockSpec((tn, tf), lambda i, j: (i, j)),
        compiler_params=pltpu.CompilerParams(
            dimension_semantics=("parallel", "parallel"),
            vmem_limit_bytes=vmem_limit,
        ),
        cost_estimate=pl.CostEstimate(
            flops=0,
            transcendentals=0,
            bytes_accessed=2 * rows * cols * dsize,
        ),
    )(x2)

    return out2.reshape(n, flat)  # metadata-only


if __name__ == "__main__":
    key = jax.random.PRNGKey(0)

    # Primary check: small NCHW feature map, f32.
    x = jax.random.normal(key, (2, 4, 16, 16), dtype=jnp.float32)
    out = jax.block_until_ready(flatten(x))
    ref = x.reshape(x.shape[0], -1)
    assert out.shape == (2, 4 * 16 * 16), out.shape
    assert out.dtype == x.dtype
    assert jnp.array_equal(out, ref), "mismatch vs reference flatten (f32)"

    # Extra coverage: non-128-aligned flat (masked edge path), f32.
    k2, k3 = jax.random.split(key)
    y = jax.random.normal(k2, (4, 3, 7, 5), dtype=jnp.float32)
    out_y = jax.block_until_ready(flatten(y))
    assert jnp.array_equal(out_y, y.reshape(4, -1)), "mismatch (non-aligned)"

    # Extra coverage: small batch + bf16 (slab re-factor + dtype-scaled tile).
    z = jax.random.normal(k3, (2, 8, 32, 32), dtype=jnp.bfloat16)
    out_z = jax.block_until_ready(flatten(z))
    assert jnp.array_equal(out_z, z.reshape(2, -1)), "mismatch (bf16)"

    print("KERNEL_OK")
</pallas_src>

<mosaic_0001>
module attributes {stable_mosaic.version = 11 : i64} {
  func.func @_copy_kernel(%arg0: i32, %arg1: i32, %arg2: memref<8x256xf32, #tpu.memory_space<vmem>>, %arg3: memref<8x256xf32, #tpu.memory_space<vmem>>) attributes {dimension_semantics = [#tpu.dimension_semantics<parallel>, #tpu.dimension_semantics<parallel>], iteration_bounds = array<i64: 1, 1>, scalar_prefetch = 0 : i64, scratch_operands = 0 : i64, tpu.core_type = #tpu.core_type<tc>, window_params = [{transform_indices = @transform_0, window_bounds = array<i64: 8, 256>}, {transform_indices = @transform_1, window_bounds = array<i64: 8, 256>}]} {
    %c0 = arith.constant 0 : index
    %c0_0 = arith.constant 0 : index
    %0 = vector.load %arg2[%c0, %c0_0] : memref<8x256xf32, #tpu.memory_space<vmem>>, vector<8x256xf32>
    %c0_1 = arith.constant 0 : index
    %c0_2 = arith.constant 0 : index
    %1 = vector.load %arg3[%c0_1, %c0_2] : memref<8x256xf32, #tpu.memory_space<vmem>>, vector<8x256xf32>
    tpu.vector_store %arg3[%c0_1, %c0_2], %0 {strides = array<i32>} : memref<8x256xf32, #tpu.memory_space<vmem>>, vector<8x256xf32>,
    return
  }
  func.func @transform_0(%arg0: i32, %arg1: i32) -> (i32, i32) {
    %c0_i32 = arith.constant 0 : i32
    return %arg0, %arg1 : i32, i32
  }
  func.func @transform_1(%arg0: i32, %arg1: i32) -> (i32, i32) {
    %c0_i32 = arith.constant 0 : i32
    return %arg0, %arg1 : i32, i32
  }
}

</mosaic_0001>

<bundles_post_ra>
// kernel: tpu_custom_call.1
= control target key start
LH: loop header
LB: loop body
LE: loop exit
PB: predicated region body
PF: predicated region fallthrough
CT: control target
= control target key end

     0   :  { %6 = vsyncpa [#allocation3], 0  ;;  %s104_s0 = inlined_call_operand.hbm [shape: f32[8,256], index: 0, kind: input, shape index: {}]   ;;  %s105_s1 = inlined_call_operand.hbm [shape: f32[8,256], index: 1, kind: output, shape index: {}]  }
   0x1   :  { %7 = vsyncpa [#allocation4], 0  ;;  %s86_s6 = smov [#allocation2]  }
   0x2   :  { %s14_s7 = sshll.u32 %s86_s6, 4  ;;  %s15_s7 = int_to_ptr.vmem [resolvable:$true] %s14_s7 }
   0x3   :  { %s50_s8 = scalar_lea.vmem %s15_s7, 256  ;;  %p55_p1 = scmp.lt.s32.totalorder %s15_s7, %s15_s7 }
   0x4   :  { %p51_p0 = scmp.ne.s32.totalorder %s15_s7, %s50_s8  ;;  %p56_p2 = scmp.lt.s32.totalorder %s50_s8, %s50_s8 }
   0x6   :  { %p57_p3 = por %p56_p2, %p55_p1 }
   0x8   :  { %p58_p4 = pnand %p57_p3, %p51_p0 }
   0xa   :  { %61 = shalt.err (!%p58_p4)
}
   0xb   :  { %17 = dma.hbm_to_vmem [thread:$0]  %s104_s0, 256, %s15_s7, [#allocation3]  }
   0xc   :  { %82 = dma.done.wait [#allocation3], 256  }
   0xd   :  { %83 = vsyncadd [#allocation3], 4294967040  ;;  %s87_s11 = smov [#allocation5]   ;;  %v21_v0 = vld [vmem:[#allocation2] sm:$0xff]  ;;  %v22_v1 = vld [vmem:[#allocation2 + $0x8] sm:$0xff] }
   0xe   :  { %s31_s12 = sshll.u32 %s87_s11, 4  ;;  %23 = vst [vmem:[#allocation5] sm:$0xff] %v21_v0  ;;  %24 = vst [vmem:[#allocation5 + $0x8] sm:$0xff] %v22_v1  ;;  %s32_s12 = int_to_ptr.vmem [resolvable:$true] %s31_s12 }
   0xf   :  { %s62_s13 = scalar_lea.vmem %s32_s12, 256  ;;  %p67_p6 = scmp.lt.s32.totalorder %s32_s12, %s32_s12 }
  0x10   :  { %p63_p5 = scmp.ne.s32.totalorder %s32_s12, %s62_s13  ;;  %p68_p7 = scmp.lt.s32.totalorder %s62_s13, %s62_s13 }
  0x12   :  { %p69_p8 = por %p68_p7, %p67_p6 }
  0x14   :  { %p70_p9 = pnand %p69_p8, %p63_p5 }
  0x16   :  { %73 = shalt.err (!%p70_p9)
}
  0x17   :  { %34 = dma.vmem_to_hbm [thread:$0]  %s32_s12, 256, %s105_s1, [#allocation4]  }
  0x18   :  { %84 = dma.done.wait [#allocation4], 256  }
  0x19   :  { %85 = vsyncadd [#allocation4], 4294967040 }
  0x1a   :  { %38 = vsyncpa [#allocation3], 1 }
  0x1b   :  { %39 = vsyncpa [#allocation4], 1 }

</bundles_post_ra>
